<compile_context>
chip_gen: v7x
topology: tpu7x:2x2x1
jax: 0.10.0
libtpu: 0.0.40
codegen_flags: <defaults>
</compile_context>

<pallas_src>
import functools

import jax
import jax.numpy as jnp
from jax.experimental import pallas as pl
from jax.experimental.pallas import tpu as pltpu


# ---------------------------------------------------------------------------
# Tile sizing helper: largest row tile (multiple of 8) whose single block copy
# fits the budget.  BlockSpec double-buffers each operand, so the in-flight
# VMEM is ~2x this budget; 6 MiB keeps it under v5e's 16 MiB default scoped
# VMEM (and well under v6e/v7x defaults).
# ---------------------------------------------------------------------------
def _pick_tile_rows(n_rows, row_bytes, cap=512, budget_bytes=6 << 20):
    t = min(cap, max(1, budget_bytes // max(row_bytes, 1)))
    if t >= n_rows:
        return n_rows                 # one full-extent block (always legal)
    return max(8, (t // 8) * 8)       # tiled path: multiple of 8 rows


# ---------------------------------------------------------------------------
# SageGCN kernel: h = relu?( src @ W_self + mean(nbr, axis=1) @ W_agg )
# with W = [W_self; W_agg] pre-stacked as (2*D_in, D_out) in bf16.
# ---------------------------------------------------------------------------
def _sage_gcn_kernel(src_ref, nbr_ref, w_ref, out_ref, *, inv_k, apply_relu):
    d_in = src_ref.shape[1]
    src = src_ref[...].astype(jnp.bfloat16)                       # (T, D_in)
    # mean aggregation: f32 sum over K neighbours, 1/K folded into the cast
    agg = (jnp.sum(nbr_ref[...], axis=1) * inv_k).astype(jnp.bfloat16)
    w = w_ref[...]                                                # (2*D_in, D_out) bf16
    h = jnp.dot(src, w[:d_in], preferred_element_type=jnp.float32)
    h = h + jnp.dot(agg, w[d_in:], preferred_element_type=jnp.float32)
    if apply_relu:
        h = jnp.maximum(h, 0.0)
    out_ref[...] = h.astype(out_ref.dtype)


def sage_gcn(src, nbr, w_stacked, apply_relu, *, tile_rows=None):
    n, d_in = src.shape
    k = nbr.shape[1]
    d_out = w_stacked.shape[1]
    if tile_rows is None:
        row_bytes = (d_in * (1 + k) + d_out) * 4
        tile_rows = _pick_tile_rows(n, row_bytes)
    tile_rows = min(tile_rows, n)
    grid = (pl.cdiv(n, tile_rows),)
    kernel = functools.partial(
        _sage_gcn_kernel, inv_k=1.0 / float(k), apply_relu=bool(apply_relu))
    return pl.pallas_call(
        kernel,
        out_shape=jax.ShapeDtypeStruct((n, d_out), jnp.float32),
        grid=grid,
        in_specs=[
            pl.BlockSpec((tile_rows, d_in), lambda i: (i, 0)),
            pl.BlockSpec((tile_rows, k, d_in), lambda i: (i, 0, 0)),
            # constant weight block, same for every grid step
            pl.BlockSpec((2 * d_in, d_out), lambda i: (0, 0)),
        ],
        out_specs=pl.BlockSpec((tile_rows, d_out), lambda i: (i, 0)),
        compiler_params=pltpu.CompilerParams(
            dimension_semantics=("parallel",)),
    )(src, nbr, w_stacked)


# ---------------------------------------------------------------------------
# Edge-head MLP kernel:
#   Linear(H + D -> Hm) (split into W1_self / W1_nbr, so the wide edge-feature
#   concat is never materialized) -> LayerNorm(Hm) -> ReLU -> Linear(Hm -> 1)
# Output is written lane-dense as (tile, 128); wrapper slices column 0.
# ---------------------------------------------------------------------------
def _mlp_edge_kernel(self_ref, nbr_ref, w1s_ref, w1n_ref, b1_ref, g_ref,
                     beta_ref, w2t_ref, b2_ref, out_ref):
    h = jnp.dot(self_ref[...].astype(jnp.bfloat16), w1s_ref[...],
                preferred_element_type=jnp.float32)
    h = h + jnp.dot(nbr_ref[...].astype(jnp.bfloat16), w1n_ref[...],
                    preferred_element_type=jnp.float32)
    h = h + b1_ref[...]
    # LayerNorm (eps=1e-5), stats kept in f32
    mu = jnp.mean(h, axis=-1, keepdims=True)
    var = jnp.mean(jnp.square(h - mu), axis=-1, keepdims=True)
    h = (h - mu) * jax.lax.rsqrt(var + 1e-5)
    h = h * g_ref[...] + beta_ref[...]
    h = jnp.maximum(h, 0.0)                                       # ReLU
    # Linear(Hm -> 1) as VPU multiply + XLU lane reduce (MXU would use 1/128 cols)
    logit = jnp.sum(h * w2t_ref[...], axis=-1, keepdims=True) + b2_ref[...]
    out_ref[...] = jnp.broadcast_to(logit, out_ref.shape)         # lane-dense store


def mlp_edge_forward(self_rep, nbr_raw, mlp_params, *, tile_rows=None):
    w1s, w1n, b1, gamma, beta, w2t, b2 = mlp_params
    e, h_dim = self_rep.shape
    d_in = nbr_raw.shape[1]
    if tile_rows is None:
        row_bytes = (h_dim + d_in + 128) * 4
        tile_rows = _pick_tile_rows(e, row_bytes)
    tile_rows = min(tile_rows, e)
    grid = (pl.cdiv(e, tile_rows),)
    out = pl.pallas_call(
        _mlp_edge_kernel,
        out_shape=jax.ShapeDtypeStruct((e, 128), jnp.float32),
        grid=grid,
        in_specs=[
            pl.BlockSpec((tile_rows, h_dim), lambda i: (i, 0)),
            pl.BlockSpec((tile_rows, d_in), lambda i: (i, 0)),
            pl.BlockSpec(w1s.shape, lambda i: (0, 0)),
            pl.BlockSpec(w1n.shape, lambda i: (0, 0)),
            pl.BlockSpec(b1.shape, lambda i: (0, 0)),
            pl.BlockSpec(gamma.shape, lambda i: (0, 0)),
            pl.BlockSpec(beta.shape, lambda i: (0, 0)),
            pl.BlockSpec(w2t.shape, lambda i: (0, 0)),
            pl.BlockSpec(b2.shape, lambda i: (0, 0)),
        ],
        out_specs=pl.BlockSpec((tile_rows, 128), lambda i: (i, 0)),
        compiler_params=pltpu.CompilerParams(
            dimension_semantics=("parallel",)),
    )(self_rep, nbr_raw, w1s, w1n, b1, gamma, beta, w2t, b2)
    return out[:, :1]                                             # (E, 1)


# ---------------------------------------------------------------------------
# GraphSage forward (matches the PyTorch module's forward loop structure,
# with all hops of a layer batched into one launch when they share K).
# ---------------------------------------------------------------------------
def graphsage_forward(node_features_list, params, num_neighbors_list):
    num_layers = len(num_neighbors_list)
    hidden = list(node_features_list)
    for i in range(num_layers):
        w_stacked, apply_relu = params["gcn"][i]
        n_hops = num_layers - i
        ks = [int(num_neighbors_list[h]) for h in range(n_hops)]
        srcs = [hidden[h] for h in range(n_hops)]
        nbrs = [hidden[h + 1].reshape(srcs[h].shape[0], ks[h], -1)
                for h in range(n_hops)]
        if n_hops > 1 and len(set(ks)) == 1:
            # all hops of this layer share (weights, K): one launch per layer
            src_all = jnp.concatenate(srcs, axis=0)
            nbr_all = jnp.concatenate(nbrs, axis=0)
            out_all = sage_gcn(src_all, nbr_all, w_stacked, apply_relu)
            offs = [0]
            for s in srcs:
                offs.append(offs[-1] + s.shape[0])
            hidden = [out_all[offs[h]:offs[h + 1]] for h in range(n_hops)]
        else:
            hidden = [sage_gcn(srcs[h], nbrs[h], w_stacked, apply_relu)
                      for h in range(n_hops)]
    # Edge head: pair each first-hop neighbour's *raw* features with its
    # source node's final embedding. The PyTorch repeat+cat of the wide
    # features is fused into the MLP kernel via the split W1; only the
    # narrow (E, H) repeated self embedding is built here.
    k0 = int(num_neighbors_list[0])
    self_rep = jnp.repeat(hidden[0], k0, axis=0)      # (E, H) -- cheap, narrow
    nbr_raw = node_features_list[1]                   # (E, D) -- read once in-kernel
    return mlp_edge_forward(self_rep, nbr_raw, params["mlp"])


# ---------------------------------------------------------------------------
# Deterministic parameter construction (synthetic weights, no checkpoint load)
# ---------------------------------------------------------------------------
def init_params(key, input_dim, hidden_dim):
    keys = jax.random.split(key, 8)

    def lin(k, fan_in, fan_out):
        return jax.random.normal(k, (fan_in, fan_out), jnp.float32) / jnp.sqrt(
            jnp.float32(fan_in))

    # gcn[0]: SageGCN(input_dim, hidden_dim[0]), activation=ReLU
    # gcn[1]: SageGCN(hidden_dim[0], hidden_dim[0]), activation=None
    # Each layer stores W = [W_self; W_agg] stacked (2*D_in, D_out) in bf16.
    w_gcn0 = jnp.concatenate(
        [lin(keys[0], input_dim, hidden_dim[0]),
         lin(keys[1], input_dim, hidden_dim[0])], axis=0).astype(jnp.bfloat16)
    w_gcn1 = jnp.concatenate(
        [lin(keys[2], hidden_dim[0], hidden_dim[0]),
         lin(keys[3], hidden_dim[0], hidden_dim[0])], axis=0).astype(jnp.bfloat16)
    gcn = [(w_gcn0, True), (w_gcn1, False)]

    # MLP(hidden_dim[0] + input_dim, 1, hidden_dim[0]):
    # Linear -> LayerNorm -> ReLU -> Linear  (PyTorch hardcodes 6424 = movielens
    # feature dim; here the script's input_dim plays that role).
    h = hidden_dim[0]
    w1_full = lin(keys[4], h + input_dim, h)
    w1_self = w1_full[:h].astype(jnp.bfloat16)        # rows hit by the self embedding
    w1_nbr = w1_full[h:].astype(jnp.bfloat16)         # rows hit by the raw neighbour feats
    b1 = jax.random.normal(keys[5], (1, h), jnp.float32) * 0.01
    gamma = jnp.ones((1, h), jnp.float32)
    beta = jnp.zeros((1, h), jnp.float32)
    w2t = lin(keys[6], h, 1).T                        # (1, h) for VPU mul + lane reduce
    b2 = jax.random.normal(keys[7], (1, 1), jnp.float32) * 0.01
    return {"gcn": gcn, "mlp": (w1_self, w1_nbr, b1, gamma, beta, w2t, b2)}


if __name__ == "__main__":
    # Small, consistent shapes:
    #   num_neighbors_list = [4, 4] -> 2 GraphSage layers
    #   node_features_list = [(N0, D), (N0*4, D), (N0*4*4, D)]
    N0 = 8
    num_neighbors_list = [4, 4]
    input_dim = 16
    hidden_dim = [32, 32]

    key = jax.random.PRNGKey(0)
    k_params, k0, k1, k2 = jax.random.split(key, 4)

    node_features_list = [
        jax.random.normal(k0, (N0, input_dim), jnp.float32),
        jax.random.normal(k1, (N0 * num_neighbors_list[0], input_dim), jnp.float32),
        jax.random.normal(
            k2, (N0 * num_neighbors_list[0] * num_neighbors_list[1], input_dim),
            jnp.float32),
    ]

    params = init_params(k_params, input_dim, hidden_dim)

    edge_logits = graphsage_forward(node_features_list, params, num_neighbors_list)
    jax.block_until_ready(edge_logits)
    assert edge_logits.shape == (N0 * num_neighbors_list[0], 1)
    assert bool(jnp.isfinite(edge_logits).all())
    print("KERNEL_OK")
</pallas_src>

<mosaic_0001>
module attributes {stable_mosaic.version = 11 : i64} {
  func.func @_sage_gcn_kernel(%arg0: i32, %arg1: memref<40x16xf32, #tpu.memory_space<vmem>>, %arg2: memref<40x4x16xf32, #tpu.memory_space<vmem>>, %arg3: memref<32x32xbf16, #tpu.memory_space<vmem>>, %arg4: memref<40x32xf32, #tpu.memory_space<vmem>>) attributes {dimension_semantics = [#tpu.dimension_semantics<parallel>], iteration_bounds = array<i64: 1>, scalar_prefetch = 0 : i64, scratch_operands = 0 : i64, tpu.core_type = #tpu.core_type<tc>, window_params = [{transform_indices = @transform_0, window_bounds = array<i64: 40, 16>}, {transform_indices = @transform_1, window_bounds = array<i64: 40, 4, 16>}, {pipeline_mode = #tpu.pipeline_mode<synchronous>, transform_indices = @transform_2, window_bounds = array<i64: 32, 32>}, {transform_indices = @transform_3, window_bounds = array<i64: 40, 32>}]} {
    %c0 = arith.constant 0 : index
    %c0_0 = arith.constant 0 : index
    %0 = vector.load %arg1[%c0, %c0_0] : memref<40x16xf32, #tpu.memory_space<vmem>>, vector<40x16xf32>
    %1 = arith.truncf %0 : vector<40x16xf32> to vector<40x16xbf16>
    %c0_1 = arith.constant 0 : index
    %c0_2 = arith.constant 0 : index
    %c0_3 = arith.constant 0 : index
    %2 = vector.load %arg2[%c0_1, %c0_2, %c0_3] : memref<40x4x16xf32, #tpu.memory_space<vmem>>, vector<40x4x16xf32>
    %cst = arith.constant dense<0.000000e+00> : vector<40x16xf32>
    %3 = vector.multi_reduction <add>, %2, %cst [1] : vector<40x4x16xf32> to vector<40x16xf32>
    %cst_4 = arith.constant 2.500000e-01 : f32
    %4 = vector.broadcast %cst_4 : f32 to vector<40x16xf32>
    %5 = arith.mulf %3, %4 : vector<40x16xf32>
    %6 = arith.truncf %5 : vector<40x16xf32> to vector<40x16xbf16>
    %c0_5 = arith.constant 0 : index
    %c0_6 = arith.constant 0 : index
    %7 = vector.load %arg3[%c0_5, %c0_6] : memref<32x32xbf16, #tpu.memory_space<vmem>>, vector<32x32xbf16>
    %8 = vector.extract_strided_slice %7 {offsets = [0, 0], sizes = [16, 32], strides = [1, 1]} : vector<32x32xbf16> to vector<16x32xbf16>
    %cst_7 = arith.constant dense<0.000000e+00> : vector<40x32xf32>
    %9 = tpu.matmul %1, %8, %cst_7 {dimension_numbers = #tpu.dot_dimension_numbers<[1], [0], [0], [1], [0, 0, 1, 1], [], []>} : vector<40x16xbf16>, vector<16x32xbf16>, vector<40x32xf32> -> vector<40x32xf32>
    %10 = vector.extract_strided_slice %7 {offsets = [16, 0], sizes = [16, 32], strides = [1, 1]} : vector<32x32xbf16> to vector<16x32xbf16>
    %cst_8 = arith.constant dense<0.000000e+00> : vector<40x32xf32>
    %11 = tpu.matmul %6, %10, %cst_8 {dimension_numbers = #tpu.dot_dimension_numbers<[1], [0], [0], [1], [0, 0, 1, 1], [], []>} : vector<40x16xbf16>, vector<16x32xbf16>, vector<40x32xf32> -> vector<40x32xf32>
    %12 = arith.addf %9, %11 : vector<40x32xf32>
    %cst_9 = arith.constant 0.000000e+00 : f32
    %13 = vector.broadcast %cst_9 : f32 to vector<40x32xf32>
    %14 = arith.maximumf %12, %13 : vector<40x32xf32>
    %c0_10 = arith.constant 0 : index
    %c0_11 = arith.constant 0 : index
    %15 = vector.load %arg4[%c0_10, %c0_11] : memref<40x32xf32, #tpu.memory_space<vmem>>, vector<40x32xf32>
    tpu.vector_store %arg4[%c0_10, %c0_11], %14 {strides = array<i32>} : memref<40x32xf32, #tpu.memory_space<vmem>>, vector<40x32xf32>,
    return
  }
  func.func @transform_0(%arg0: i32) -> (i32, i32) {
    %c0_i32 = arith.constant 0 : i32
    %c0_i32_0 = arith.constant 0 : i32
    return %arg0, %c0_i32 : i32, i32
  }
  func.func @transform_1(%arg0: i32) -> (i32, i32, i32) {
    %c0_i32 = arith.constant 0 : i32
    %c0_i32_0 = arith.constant 0 : i32
    %c0_i32_1 = arith.constant 0 : i32
    return %arg0, %c0_i32, %c0_i32_0 : i32, i32, i32
  }
  func.func @transform_2(%arg0: i32) -> (i32, i32) {
    %c0_i32 = arith.constant 0 : i32
    %c0_i32_0 = arith.constant 0 : i32
    %c0_i32_1 = arith.constant 0 : i32
    return %c0_i32, %c0_i32_0 : i32, i32
  }
  func.func @transform_3(%arg0: i32) -> (i32, i32) {
    %c0_i32 = arith.constant 0 : i32
    %c0_i32_0 = arith.constant 0 : i32
    return %arg0, %c0_i32 : i32, i32
  }
}

</mosaic_0001>

<bundles_post_ra>
// kernel: tpu_custom_call.1
= control target key start
LH: loop header
LB: loop body
LE: loop exit
PB: predicated region body
PF: predicated region fallthrough
CT: control target
= control target key end

     0   :  { %v764_v0 = vmov 0.0   ;;  %vm765_vm0 = vmmov 0   ;;  %vm559_vm1 = vcmask 130048   ;;  %vm63_vm2 = vcmask 125952   ;;  %s1063_s2 = inlined_call_operand.vmem [shape: bf16[32,32], index: 2, kind: input, shape index: {}]   ;;  %s1064_s0 = inlined_call_operand.vmem [shape: f32[40,16], index: 0, kind: input, shape index: {}]   ;;  %s1065_s1 = inlined_call_operand.vmem [shape: f32[40,4,16], index: 1, kind: input, shape index: {}]   ;;  %s1066_s3 = inlined_call_operand.vmem [shape: f32[40,32], index: 3, kind: output, shape index: {}]  }
   0x1   :  { %741 = vmatprep.subr.bf16.mxu0 %v764_v0  ;;  %v762_v1 = vld [vmem:[%s1063_s2] sm:$0xff]   ;;  %727 = vmatprep.subr.bf16.mxu1 %v764_v0  ;;  %v763_v2 = vld [vmem:[%s1063_s2 + $0x8] sm:$0xff]   ;;  %v27_v10 = vld [vmem:[%s1065_s1 + $0x10] sm:$0xf]  ;;  %vm508_vm3 = vcmask 1041409   ;;  %vm510_vm4 = vcmask 1042434  }
   0x2   :  { %743 = vmatprep.mubr.msk.bf16.mxu0 %vm765_vm0, %v764_v0  ;;  %729 = vmatprep.mubr.msk.bf16.mxu1 %vm765_vm0, %v764_v0  ;;  %v15_v3 = vld [vmem:[%s1064_s0] sm:$0xff]  ;;  %v16_v4 = vld [vmem:[%s1064_s0 + $0x8] sm:$0xff]  ;;  %v28_v11 = vld [vmem:[%s1065_s1 + $0x14] sm:$0xf]  ;;  %v92_v22 = vsel %vm63_vm2, %v27_v10, 0.0  ;;  %vm512_vm5 = vcmask 1043459  }
   0x3   :  { %742 = vmatpush3.bf16.msra.mxu0 %v762_v1  ;;  %728 = vmatpush3.bf16.msra.mxu1 %v763_v2  ;;  %v20_v5 = vpack.c.bf16 %v16_v4, %v15_v3  ;;  %v23_v6 = vld [vmem:[%s1065_s1] sm:$0xf]  ;;  %v24_v7 = vld [vmem:[%s1065_s1 + $0x4] sm:$0xf]  ;;  %v25_v8 = vld [vmem:[%s1065_s1 + $0x8] sm:$0xf] }
   0x4   :  { %v26_v9 = vld [vmem:[%s1065_s1 + $0xc] sm:$0xf]  ;;  %v29_v12 = vld [vmem:[%s1065_s1 + $0x18] sm:$0xf]  ;;  %v30_v13 = vld [vmem:[%s1065_s1 + $0x1c] sm:$0xf] }
   0x5   :  { %v64_v14 = vsel %vm63_vm2, %v23_v6, 0.0  ;;  %v71_v15 = vsel %vm63_vm2, %v24_v7, 0.0  ;;  %v78_v16 = vsel %vm63_vm2, %v25_v8, 0.0  ;;  %v85_v17 = vsel %vm63_vm2, %v26_v9, 0.0  ;;  %v31_v50 = vld [vmem:[%s1065_s1 + $0x20] sm:$0xf] }
   0x6   :  { %744 = vmatmul.mubr.msk.bf16.vlgmr.msra.gmra.mrb[0].mxu0 %vm559_vm1, %v20_v5  ;;  %v65_v18 = vrot.slane %v64_v14, 4  ;;  %v72_v19 = vrot.slane %v71_v15, 4  ;;  %v79_v20 = vrot.slane %v78_v16, 4  ;;  %v86_v21 = vrot.slane %v85_v17, 4  ;;  %v32_v55 = vld [vmem:[%s1065_s1 + $0x24] sm:$0xf] }
   0x7   :  { %747 = vmatprep.mubr.msk.bf16.mxu0 %vm765_vm0, %v764_v0  ;;  %v99_v23 = vsel %vm63_vm2, %v28_v11, 0.0  ;;  %v106_v24 = vsel %vm63_vm2, %v29_v12, 0.0  ;;  %v113_v25 = vsel %vm63_vm2, %v30_v13, 0.0  ;;  %v93_v30 = vrot.slane %v92_v22, 4  ;;  %v33_v56 = vld [vmem:[%s1065_s1 + $0x28] sm:$0xf] }
   0x8   :  { %v66_v26 = vadd.f32 %v65_v18, %v64_v14  ;;  %v73_v27 = vadd.f32 %v72_v19, %v71_v15  ;;  %v80_v28 = vadd.f32 %v79_v20, %v78_v16  ;;  %v87_v29 = vadd.f32 %v86_v21, %v85_v17  ;;  %v34_v57 = vld [vmem:[%s1065_s1 + $0x2c] sm:$0xf]  ;;  %v35_v62 = vld [vmem:[%s1065_s1 + $0x30] sm:$0xf]  ;;  %v36_v63 = vld [vmem:[%s1065_s1 + $0x34] sm:$0xf] }
   0x9   :  { %v100_v31 = vrot.slane %v99_v23, 4  ;;  %v107_v32 = vrot.slane %v106_v24, 4  ;;  %v114_v33 = vrot.slane %v113_v25, 4  ;;  %v94_v38 = vadd.f32 %v93_v30, %v92_v22  ;;  %v37_v5 = vld [vmem:[%s1065_s1 + $0x38] sm:$0xf] }
   0xa   :  { %v67_v34 = vrot.slane %v66_v26, 2  ;;  %v74_v35 = vrot.slane %v73_v27, 2  ;;  %v81_v36 = vrot.slane %v80_v28, 2  ;;  %v88_v37 = vrot.slane %v87_v29, 2  ;;  %v38_v10 = vld [vmem:[%s1065_s1 + $0x3c] sm:$0xf] }
   0xb   :  { %v101_v39 = vadd.f32 %v100_v31, %v99_v23  ;;  %v108_v40 = vadd.f32 %v107_v32, %v106_v24  ;;  %v115_v41 = vadd.f32 %v114_v33, %v113_v25  ;;  %v95_v46 = vrot.slane %v94_v38, 2 }
   0xc   :  { %v68_v42 = vadd.f32 %v67_v34, %v66_v26  ;;  %v75_v43 = vadd.f32 %v74_v35, %v73_v27  ;;  %v82_v44 = vadd.f32 %v81_v36, %v80_v28  ;;  %v89_v45 = vadd.f32 %v88_v37, %v87_v29 }
   0xd   :  { %v102_v47 = vrot.slane %v101_v39, 2  ;;  %v109_v48 = vrot.slane %v108_v40, 2  ;;  %v116_v49 = vrot.slane %v115_v41, 2  ;;  %v96_v58 = vadd.f32 %v95_v46, %v94_v38 }
   0xe   :  { %v69_v51 = vrot.slane %v68_v42, 1  ;;  %v76_v52 = vrot.slane %v75_v43, 1  ;;  %v83_v53 = vrot.slane %v82_v44, 1  ;;  %v90_v54 = vrot.slane %v89_v45, 1 }
   0xf   :  { %v103_v59 = vadd.f32 %v102_v47, %v101_v39  ;;  %v110_v60 = vadd.f32 %v109_v48, %v108_v40  ;;  %v117_v61 = vadd.f32 %v116_v49, %v115_v41  ;;  %v97_v6 = vrot.slane %v96_v58, 1 }
  0x10   :  { %v857_v1 = vadd.f32 %v69_v51, %v68_v42  ;;  %v859_v2 = vadd.f32 %v76_v52, %v75_v43  ;;  %v861_v3 = vadd.f32 %v83_v53, %v82_v44  ;;  %v863_v4 = vadd.f32 %v90_v54, %v89_v45 }
  0x11   :  { %v104_v7 = vrot.slane %v103_v59, 1  ;;  %v111_v8 = vrot.slane %v110_v60, 1  ;;  %v118_v9 = vrot.slane %v117_v61, 1  ;;  %v120_v11 = vsel %vm63_vm2, %v31_v50, 0.0 }
  0x12   :  { %v127_v12 = vsel %vm63_vm2, %v32_v55, 0.0  ;;  %v134_v13 = vsel %vm63_vm2, %v33_v56, 0.0  ;;  %v141_v14 = vsel %vm63_vm2, %v34_v57, 0.0  ;;  %v98_v15 = vadd.f32 %v97_v6, %v96_v58 }
  0x13   :  { %v105_v16 = vadd.f32 %v104_v7, %v103_v59  ;;  %v112_v17 = vadd.f32 %v111_v8, %v110_v60  ;;  %v119_v18 = vadd.f32 %v118_v9, %v117_v61  ;;  %v121_v19 = vrot.slane %v120_v11, 4 }
  0x14   :  { %v128_v20 = vrot.slane %v127_v12, 4  ;;  %v135_v21 = vrot.slane %v134_v13, 4  ;;  %v142_v22 = vrot.slane %v141_v14, 4  ;;  %v148_v23 = vsel %vm63_vm2, %v35_v62, 0.0 }
  0x15   :  { %v155_v24 = vsel %vm63_vm2, %v36_v63, 0.0  ;;  %v162_v25 = vsel %vm63_vm2, %v37_v5, 0.0  ;;  %v169_v26 = vsel %vm63_vm2, %v38_v10, 0.0  ;;  %v122_v27 = vadd.f32 %v121_v19, %v120_v11 }
  0x16   :  { %v129_v28 = vadd.f32 %v128_v20, %v127_v12  ;;  %v136_v29 = vadd.f32 %v135_v21, %v134_v13  ;;  %v143_v30 = vadd.f32 %v142_v22, %v141_v14  ;;  %v149_v31 = vrot.slane %v148_v23, 4 }
  0x17   :  { %v156_v32 = vrot.slane %v155_v24, 4  ;;  %v163_v33 = vrot.slane %v162_v25, 4  ;;  %v170_v34 = vrot.slane %v169_v26, 4  ;;  %v123_v35 = vrot.slane %v122_v27, 2 }
  0x18   :  { %v130_v36 = vrot.slane %v129_v28, 2  ;;  %v137_v37 = vrot.slane %v136_v29, 2  ;;  %v144_v38 = vrot.slane %v143_v30, 2  ;;  %v150_v39 = vadd.f32 %v149_v31, %v148_v23 }
  0x19   :  { %v157_v40 = vadd.f32 %v156_v32, %v155_v24  ;;  %v164_v41 = vadd.f32 %v163_v33, %v162_v25  ;;  %v171_v42 = vadd.f32 %v170_v34, %v169_v26  ;;  %v124_v43 = vadd.f32 %v123_v35, %v122_v27 }
  0x1a   :  { %v131_v44 = vadd.f32 %v130_v36, %v129_v28  ;;  %v138_v45 = vadd.f32 %v137_v37, %v136_v29  ;;  %v145_v46 = vadd.f32 %v144_v38, %v143_v30  ;;  %v151_v47 = vrot.slane %v150_v39, 2 }
  0x1b   :  { %v158_v48 = vrot.slane %v157_v40, 2  ;;  %v165_v49 = vrot.slane %v164_v41, 2  ;;  %v172_v50 = vrot.slane %v171_v42, 2  ;;  %v125_v51 = vrot.slane %v124_v43, 1 }
  0x1c   :  { %v132_v52 = vrot.slane %v131_v44, 1  ;;  %v139_v53 = vrot.slane %v138_v45, 1  ;;  %v146_v54 = vrot.slane %v145_v46, 1  ;;  %v152_v55 = vadd.f32 %v151_v47, %v150_v39 }
  0x1d   :  { %v159_v56 = vadd.f32 %v158_v48, %v157_v40  ;;  %v166_v57 = vadd.f32 %v165_v49, %v164_v41  ;;  %v173_v58 = vadd.f32 %v172_v50, %v171_v42  ;;  %v126_v59 = vadd.f32 %v125_v51, %v124_v43 }
  0x1e   :  { %v133_v60 = vadd.f32 %v132_v52, %v131_v44  ;;  %v140_v61 = vadd.f32 %v139_v53, %v138_v45  ;;  %v147_v62 = vadd.f32 %v146_v54, %v145_v46  ;;  %v153_v63 = vrot.slane %v152_v55, 1  ;;  %v17_v52 = vld [vmem:[%s1064_s0 + $0x10] sm:$0xff]  ;;  %v18_v53 = vld [vmem:[%s1064_s0 + $0x18] sm:$0xff]  ;;  %v39_v54 = vld [vmem:[%s1065_s1 + $0x40] sm:$0xf] }
  0x1f   :  { %v160_v5 = vrot.slane %v159_v56, 1  ;;  %v167_v6 = vrot.slane %v166_v57, 1  ;;  %v174_v7 = vrot.slane %v173_v58, 1  ;;  %v344_v8 = vmul.f32 0.25, %v857_v1 }
  0x20   :  { %v345_v9 = vmul.f32 0.25, %v859_v2  ;;  %v346_v10 = vmul.f32 0.25, %v861_v3  ;;  %v347_v11 = vmul.f32 0.25, %v863_v4  ;;  %v154_v12 = vadd.f32 %v153_v63, %v152_v55 }
  0x21   :  { %v161_v13 = vadd.f32 %v160_v5, %v159_v56  ;;  %v168_v14 = vadd.f32 %v167_v6, %v166_v57  ;;  %v175_v19 = vadd.f32 %v174_v7, %v173_v58  ;;  %v348_v20 = vmul.f32 0.25, %v98_v15 }
  0x22   :  { %v349_v21 = vmul.f32 0.25, %v105_v16  ;;  %v350_v22 = vmul.f32 0.25, %v112_v17  ;;  %v351_v23 = vmul.f32 0.25, %v119_v18  ;;  %v352_v24 = vmul.f32 0.25, %v126_v59  ;;  %v40_v59 = vld [vmem:[%s1065_s1 + $0x44] sm:$0xf] }
  0x23   :  { %v353_v25 = vmul.f32 0.25, %v133_v60  ;;  %v354_v26 = vmul.f32 0.25, %v140_v61  ;;  %v355_v27 = vmul.f32 0.25, %v147_v62  ;;  %v356_v1 = vmul.f32 0.25, %v154_v12  ;;  %v41_v61 = vld [vmem:[%s1065_s1 + $0x48] sm:$0xf] }
  0x24   :  { %v357_v2 = vmul.f32 0.25, %v161_v13  ;;  %v358_v28 = vmul.f32 0.25, %v168_v14  ;;  %v359_v3 = vmul.f32 0.25, %v175_v19  ;;  %v384_v4 = vpack.c.bf16 %v344_v8, %v344_v8 }
  0x25   :  { %v385_v29 = vpack.c.bf16 %v345_v9, %v345_v9  ;;  %v386_v30 = vpack.c.bf16 %v346_v10, %v346_v10  ;;  %v387_v31 = vpack.c.bf16 %v347_v11, %v347_v11  ;;  %vm514_vm6 = vcmask 1044484   ;;  %v42_v9 = vld [vmem:[%s1065_s1 + $0x4c] sm:$0xf] }
  0x26   :  { %v388_v15 = vpack.c.bf16 %v348_v20, %v348_v20  ;;  %v389_v16 = vpack.c.bf16 %v349_v21, %v349_v21  ;;  %v390_v17 = vpack.c.bf16 %v350_v22, %v350_v22  ;;  %v391_v18 = vpack.c.bf16 %v351_v23, %v351_v23  ;;  %v43_v22 = vld [vmem:[%s1065_s1 + $0x50] sm:$0xf] }
  0x27   :  { %v392_v32 = vpack.c.bf16 %v352_v24, %v352_v24  ;;  %v393_v33 = vpack.c.bf16 %v353_v25, %v353_v25  ;;  %v394_v34 = vpack.c.bf16 %v354_v26, %v354_v26  ;;  %v395_v35 = vpack.c.bf16 %v355_v27, %v355_v27 }
  0x28   :  { %v396_v36 = vpack.c.bf16 %v356_v1, %v356_v1  ;;  %v397_v37 = vpack.c.bf16 %v357_v2, %v357_v2  ;;  %v398_v38 = vpack.c.bf16 %v358_v28, %v358_v28  ;;  %v399_v39 = vpack.c.bf16 %v359_v3, %v359_v3  ;;  %v44_v3 = vld [vmem:[%s1065_s1 + $0x54] sm:$0xf] }
  0x29   :  { %v468_v40 = vunpack.c.l.b16 %v384_v4  ;;  %v469_v41 = vunpack.c.l.b16 %v385_v29  ;;  %v470_v42 = vunpack.c.l.b16 %v386_v30  ;;  %v471_v43 = vunpack.c.l.b16 %v387_v31  ;;  %v45_v4 = vld [vmem:[%s1065_s1 + $0x58] sm:$0xf] }
  0x2a   :  { %v472_v44 = vunpack.c.l.b16 %v388_v15  ;;  %v473_v45 = vunpack.c.l.b16 %v389_v16  ;;  %v474_v46 = vunpack.c.l.b16 %v390_v17  ;;  %v475_v47 = vunpack.c.l.b16 %v391_v18 }
  0x2b   :  { %v476_v48 = vunpack.c.l.b16 %v392_v32  ;;  %v477_v49 = vunpack.c.l.b16 %v393_v33  ;;  %v478_v50 = vunpack.c.l.b16 %v394_v34  ;;  %v479_v51 = vunpack.c.l.b16 %v395_v35  ;;  %v46_v32 = vld [vmem:[%s1065_s1 + $0x5c] sm:$0xf] }
  0x2c   :  { %v480_v55 = vunpack.c.l.b16 %v396_v36  ;;  %v481_v56 = vunpack.c.l.b16 %v397_v37  ;;  %v482_v57 = vunpack.c.l.b16 %v398_v38  ;;  %v483_v58 = vunpack.c.l.b16 %v399_v39 }
  0x2d   :  { %v509_v60 = vsel %vm508_vm3, %v469_v41, %v468_v40  ;;  %vm516_vm7 = vcmask 1045509   ;;  %vm518_vm8 = vcmask 1046534   ;;  %vm520_vm9 = vcmask 1047559  }
  0x2e   :  { %v511_v62 = vsel %vm510_vm4, %v470_v42, %v509_v60  ;;  %v522_v63 = vsel %vm508_vm3, %v477_v49, %v476_v48  ;;  %v21_v5 = vpack.c.bf16 %v18_v53, %v17_v52  ;;  %v176_v6 = vsel %vm63_vm2, %v39_v54, 0.0  ;;  %v48_v53 = vld [vmem:[%s1065_s1 + $0x64] sm:$0xf]  ;;  %v49_v54 = vld [vmem:[%s1065_s1 + $0x68] sm:$0xf] }
  0x2f   :  { %v513_v7 = vsel %vm512_vm5, %v471_v43, %v511_v62  ;;  %v523_v8 = vsel %vm510_vm4, %v478_v50, %v522_v63  ;;  %v177_v10 = vrot.slane %v176_v6, 4  ;;  %v183_v11 = vsel %vm63_vm2, %v40_v59, 0.0 }
  0x30   :  { %v515_v12 = vsel %vm514_vm6, %v472_v44, %v513_v7  ;;  %v524_v13 = vsel %vm512_vm5, %v479_v51, %v523_v8  ;;  %748 = vmatmul.mubr.msk.bf16.gmra.mrb[4].mxu0 %vm559_vm1, %v21_v5  ;;  %v184_v14 = vrot.slane %v183_v11, 4  ;;  %v190_v19 = vsel %vm63_vm2, %v41_v61, 0.0  ;;  %v47_v44 = vld [vmem:[%s1065_s1 + $0x60] sm:$0xf]  ;;  %v50_v8 = vld [vmem:[%s1065_s1 + $0x6c] sm:$0xf] }
  0x31   :  { %v517_v20 = vsel %vm516_vm7, %v473_v45, %v515_v12  ;;  %v525_v21 = vsel %vm514_vm6, %v480_v55, %v524_v13  ;;  %v178_v23 = vadd.f32 %v177_v10, %v176_v6  ;;  %v191_v24 = vrot.slane %v190_v19, 4  ;;  %751 = vmatprep.mubr.msk.bf16.mxu0 %vm765_vm0, %v764_v0 }
  0x32   :  { %v519_v25 = vsel %vm518_vm8, %v474_v46, %v517_v20  ;;  %v526_v26 = vsel %vm516_vm7, %v481_v56, %v525_v21  ;;  %v185_v27 = vadd.f32 %v184_v14, %v183_v11  ;;  %v197_v1 = vsel %vm63_vm2, %v42_v9, 0.0  ;;  %v51_v21 = vld [vmem:[%s1065_s1 + $0x70] sm:$0xf] }
  0x33   :  { %v521_v2 = vsel %vm520_vm9, %v475_v47, %v519_v25  ;;  %v527_v28 = vsel %vm518_vm8, %v482_v57, %v526_v26  ;;  %v179_v29 = vrot.slane %v178_v23, 2  ;;  %v192_v30 = vadd.f32 %v191_v24, %v190_v19 }
  0x34   :  { %v528_v31 = vsel %vm520_vm9, %v483_v58, %v527_v28  ;;  %v186_v15 = vrot.slane %v185_v27, 2  ;;  %v198_v16 = vrot.slane %v197_v1, 4  ;;  %v204_v17 = vsel %vm63_vm2, %v43_v22, 0.0  ;;  %v52_v28 = vld [vmem:[%s1065_s1 + $0x74] sm:$0xf] }
  0x35   :  { %v550_v18 = vpack.c.b16 %v528_v31, %v521_v2  ;;  %v180_v33 = vadd.f32 %v179_v29, %v178_v23  ;;  %v193_v34 = vrot.slane %v192_v30, 2  ;;  %v205_v35 = vrot.slane %v204_v17, 4 }
  0x36   :  { %v187_v36 = vadd.f32 %v186_v15, %v185_v27  ;;  %v199_v37 = vadd.f32 %v198_v16, %v197_v1  ;;  %v211_v38 = vsel %vm63_vm2, %v44_v3, 0.0  ;;  %v218_v39 = vsel %vm63_vm2, %v45_v4, 0.0  ;;  %v53_v3 = vld [vmem:[%s1065_s1 + $0x78] sm:$0xf] }
  0x37   :  { %730 = vmatmul.mubr.msk.bf16.vlgmr.msra.gmra.mrb[0].mxu1 %vm559_vm1, %v550_v18  ;;  %v181_v40 = vrot.slane %v180_v33, 1  ;;  %v194_v41 = vadd.f32 %v193_v34, %v192_v30  ;;  %v206_v42 = vadd.f32 %v205_v35, %v204_v17  ;;  %v212_v43 = vrot.slane %v211_v38, 4 }
  0x38   :  { %733 = vmatprep.mubr.msk.bf16.mxu1 %vm765_vm0, %v764_v0  ;;  %v188_v45 = vrot.slane %v187_v36, 1  ;;  %v200_v46 = vrot.slane %v199_v37, 2  ;;  %v219_v47 = vrot.slane %v218_v39, 4  ;;  %v225_v48 = vsel %vm63_vm2, %v46_v32, 0.0  ;;  %v54_v32 = vld [vmem:[%s1065_s1 + $0x7c] sm:$0xf] }
  0x39   :  { %v944_v49 = vadd.f32 %v181_v40, %v180_v33  ;;  %v195_v50 = vrot.slane %v194_v41, 1  ;;  %v207_v51 = vrot.slane %v206_v42, 2  ;;  %v213_v52 = vadd.f32 %v212_v43, %v211_v38 }
  0x3a   :  { %v952_v55 = vadd.f32 %v188_v45, %v187_v36  ;;  %v201_v56 = vadd.f32 %v200_v46, %v199_v37  ;;  %v220_v57 = vadd.f32 %v219_v47, %v218_v39  ;;  %v226_v58 = vrot.slane %v225_v48, 4 }
  0x3b   :  { %v954_v59 = vadd.f32 %v195_v50, %v194_v41  ;;  %v208_v60 = vadd.f32 %v207_v51, %v206_v42  ;;  %v214_v61 = vrot.slane %v213_v52, 2  ;;  %v232_v62 = vsel %vm63_vm2, %v47_v44, 0.0 }
  0x3c   :  { %v202_v63 = vrot.slane %v201_v56, 1  ;;  %v221_v5 = vrot.slane %v220_v57, 2  ;;  %v227_v6 = vadd.f32 %v226_v58, %v225_v48  ;;  %v233_v7 = vrot.slane %v232_v62, 4 }
  0x3d   :  { %v209_v9 = vrot.slane %v208_v60, 1  ;;  %v215_v10 = vadd.f32 %v214_v61, %v213_v52  ;;  %v239_v11 = vsel %vm63_vm2, %v48_v53, 0.0  ;;  %v246_v12 = vsel %vm63_vm2, %v49_v54, 0.0 }
  0x3e   :  { %v203_v13 = vadd.f32 %v202_v63, %v201_v56  ;;  %v222_v14 = vadd.f32 %v221_v5, %v220_v57  ;;  %v228_v19 = vrot.slane %v227_v6, 2  ;;  %v234_v20 = vadd.f32 %v233_v7, %v232_v62 }
  0x3f   :  { %v210_v22 = vadd.f32 %v209_v9, %v208_v60  ;;  %v216_v23 = vrot.slane %v215_v10, 1  ;;  %v240_v24 = vrot.slane %v239_v11, 4  ;;  %v247_v25 = vrot.slane %v246_v12, 4 }
  0x40   :  { %v223_v26 = vrot.slane %v222_v14, 1  ;;  %v229_v27 = vadd.f32 %v228_v19, %v227_v6  ;;  %v235_v1 = vrot.slane %v234_v20, 2  ;;  %v253_v2 = vsel %vm63_vm2, %v50_v8, 0.0 }
  0x41   :  { %v217_v4 = vadd.f32 %v216_v23, %v215_v10  ;;  %v241_v29 = vadd.f32 %v240_v24, %v239_v11  ;;  %v248_v30 = vadd.f32 %v247_v25, %v246_v12  ;;  %v254_v31 = vrot.slane %v253_v2, 4 }
  0x42   :  { %v224_v15 = vadd.f32 %v223_v26, %v222_v14  ;;  %v230_v16 = vrot.slane %v229_v27, 1  ;;  %v236_v17 = vadd.f32 %v235_v1, %v234_v20  ;;  %v260_v18 = vsel %vm63_vm2, %v51_v21, 0.0 }
  0x43   :  { %v242_v33 = vrot.slane %v241_v29, 2  ;;  %v249_v34 = vrot.slane %v248_v30, 2  ;;  %v255_v35 = vadd.f32 %v254_v31, %v253_v2  ;;  %v261_v36 = vrot.slane %v260_v18, 4 }
  0x44   :  { %v231_v37 = vadd.f32 %v230_v16, %v229_v27  ;;  %v237_v38 = vrot.slane %v236_v17, 1  ;;  %v267_v39 = vsel %vm63_vm2, %v52_v28, 0.0  ;;  %v274_v40 = vsel %vm63_vm2, %v53_v3, 0.0 }
  0x45   :  { %v243_v41 = vadd.f32 %v242_v33, %v241_v29  ;;  %v250_v42 = vadd.f32 %v249_v34, %v248_v30  ;;  %v256_v43 = vrot.slane %v255_v35, 2  ;;  %v262_v44 = vadd.f32 %v261_v36, %v260_v18 }
  0x46   :  { %v238_v45 = vadd.f32 %v237_v38, %v236_v17  ;;  %v268_v46 = vrot.slane %v267_v39, 4  ;;  %v275_v47 = vrot.slane %v274_v40, 4  ;;  %v281_v48 = vsel %vm63_vm2, %v54_v32, 0.0 }
  0x47   :  { %v244_v50 = vrot.slane %v243_v41, 1  ;;  %v251_v51 = vrot.slane %v250_v42, 1  ;;  %v257_v52 = vadd.f32 %v256_v43, %v255_v35  ;;  %v263_v53 = vrot.slane %v262_v44, 2 }
  0x48   :  { %v269_v54 = vadd.f32 %v268_v46, %v267_v39  ;;  %v276_v56 = vadd.f32 %v275_v47, %v274_v40  ;;  %v282_v57 = vrot.slane %v281_v48, 4  ;;  %v360_v58 = vmul.f32 0.25, %v944_v49 }
  0x49   :  { %v245_v60 = vadd.f32 %v244_v50, %v243_v41  ;;  %v252_v61 = vadd.f32 %v251_v51, %v250_v42  ;;  %v258_v62 = vrot.slane %v257_v52, 1  ;;  %v264_v63 = vadd.f32 %v263_v53, %v262_v44 }
  0x4a   :  { %v270_v5 = vrot.slane %v269_v54, 2  ;;  %v277_v6 = vrot.slane %v276_v56, 2  ;;  %v283_v7 = vadd.f32 %v282_v57, %v281_v48  ;;  %v361_v8 = vmul.f32 0.25, %v952_v55  ;;  %v55_v57 = vld [vmem:[%s1065_s1 + $0x80] sm:$0xf] }
  0x4b   :  { %v259_v9 = vadd.f32 %v258_v62, %v257_v52  ;;  %v265_v10 = vrot.slane %v264_v63, 1  ;;  %v362_v11 = vmul.f32 0.25, %v954_v59  ;;  %v363_v12 = vmul.f32 0.25, %v203_v13 }
  0x4c   :  { %v271_v14 = vadd.f32 %v270_v5, %v269_v54  ;;  %v278_v19 = vadd.f32 %v277_v6, %v276_v56  ;;  %v284_v20 = vrot.slane %v283_v7, 2  ;;  %v364_v21 = vmul.f32 0.25, %v210_v22  ;;  %v19_v56 = vld [vmem:[%s1064_s0 + $0x20] sm:$0xff] }
  0x4d   :  { %v266_v23 = vadd.f32 %v265_v10, %v264_v63  ;;  %v365_v49 = vmul.f32 0.25, %v217_v4  ;;  %v366_v24 = vmul.f32 0.25, %v224_v15  ;;  %v367_v25 = vmul.f32 0.25, %v231_v37  ;;  %v56_v63 = vld [vmem:[%s1065_s1 + $0x84] sm:$0xf] }
  0x4e   :  { %v272_v26 = vrot.slane %v271_v14, 1  ;;  %v279_v27 = vrot.slane %v278_v19, 1  ;;  %v285_v1 = vadd.f32 %v284_v20, %v283_v7  ;;  %v368_v2 = vmul.f32 0.25, %v238_v45 }
  0x4f   :  { %v369_v28 = vmul.f32 0.25, %v245_v60  ;;  %v370_v3 = vmul.f32 0.25, %v252_v61  ;;  %v371_v55 = vmul.f32 0.25, %v259_v9  ;;  %v372_v29 = vmul.f32 0.25, %v266_v23  ;;  %v57_v9 = vld [vmem:[%s1065_s1 + $0x88] sm:$0xf] }
  0x50   :  { %v273_v30 = vadd.f32 %v272_v26, %v271_v14  ;;  %v280_v31 = vadd.f32 %v279_v27, %v278_v19  ;;  %v286_v59 = vrot.slane %v285_v1, 1  ;;  %v400_v13 = vpack.c.bf16 %v360_v58, %v360_v58 }
  0x51   :  { %v401_v16 = vpack.c.bf16 %v361_v8, %v361_v8  ;;  %v402_v17 = vpack.c.bf16 %v362_v11, %v362_v11  ;;  %v403_v18 = vpack.c.bf16 %v363_v12, %v363_v12  ;;  %v404_v22 = vpack.c.bf16 %v364_v21, %v364_v21  ;;  %v58_v21 = vld [vmem:[%s1065_s1 + $0x8c] sm:$0xf] }
  0x52   :  { %v287_v32 = vadd.f32 %v286_v59, %v285_v1  ;;  %v373_v4 = vmul.f32 0.25, %v273_v30  ;;  %v374_v15 = vmul.f32 0.25, %v280_v31  ;;  %v405_v33 = vpack.c.bf16 %v365_v49, %v365_v49 }
  0x53   :  { %v406_v34 = vpack.c.bf16 %v366_v24, %v366_v24  ;;  %v407_v35 = vpack.c.bf16 %v367_v25, %v367_v25  ;;  %v408_v36 = vpack.c.bf16 %v368_v2, %v368_v2  ;;  %v409_v37 = vpack.c.bf16 %v369_v28, %v369_v28  ;;  %v59_v28 = vld [vmem:[%s1065_s1 + $0x90] sm:$0xf] }
  0x54   :  { %v375_v38 = vmul.f32 0.25, %v287_v32  ;;  %v410_v39 = vpack.c.bf16 %v370_v3, %v370_v3  ;;  %v411_v40 = vpack.c.bf16 %v371_v55, %v371_v55  ;;  %v412_v41 = vpack.c.bf16 %v372_v29, %v372_v29 }
  0x55   :  { %v413_v42 = vpack.c.bf16 %v373_v4, %v373_v4  ;;  %v414_v43 = vpack.c.bf16 %v374_v15, %v374_v15  ;;  %v484_v44 = vunpack.c.l.b16 %v400_v13  ;;  %v485_v45 = vunpack.c.l.b16 %v401_v16 }
  0x56   :  { %v415_v46 = vpack.c.bf16 %v375_v38, %v375_v38  ;;  %v486_v47 = vunpack.c.l.b16 %v402_v17  ;;  %v487_v48 = vunpack.c.l.b16 %v403_v18  ;;  %v488_v50 = vunpack.c.l.b16 %v404_v22  ;;  %v60_v17 = vld [vmem:[%s1065_s1 + $0x94] sm:$0xf]  ;;  %v61_v18 = vld [vmem:[%s1065_s1 + $0x98] sm:$0xf] }
  0x57   :  { %v489_v51 = vunpack.c.l.b16 %v405_v33  ;;  %v490_v52 = vunpack.c.l.b16 %v406_v34  ;;  %v491_v53 = vunpack.c.l.b16 %v407_v35  ;;  %v492_v54 = vunpack.c.l.b16 %v408_v36  ;;  %v62_v36 = vld [vmem:[%s1065_s1 + $0x9c] sm:$0xf] }
  0x58   :  { %v493_v58 = vunpack.c.l.b16 %v409_v37  ;;  %v494_v60 = vunpack.c.l.b16 %v410_v39  ;;  %v495_v61 = vunpack.c.l.b16 %v411_v40  ;;  %v496_v62 = vunpack.c.l.b16 %v412_v41 }
  0x59   :  { %v497_v5 = vunpack.c.l.b16 %v413_v42  ;;  %v498_v6 = vunpack.c.l.b16 %v414_v43  ;;  %v499_v7 = vunpack.c.l.b16 %v415_v46  ;;  %v529_v8 = vsel %vm508_vm3, %v485_v45, %v484_v44 }
  0x5a   :  { %v530_v10 = vsel %vm510_vm4, %v486_v47, %v529_v8  ;;  %v536_v11 = vsel %vm508_vm3, %v493_v58, %v492_v54  ;;  %v22_v12 = vpack.c.bf16 %v19_v56, %v19_v56  ;;  %v288_v14 = vsel %vm63_vm2, %v55_v57, 0.0 }
  0x5b   :  { %v531_v19 = vsel %vm512_vm5, %v487_v48, %v530_v10  ;;  %v537_v20 = vsel %vm510_vm4, %v494_v60, %v536_v11  ;;  %v289_v23 = vrot.slane %v288_v14, 4  ;;  %v295_v49 = vsel %vm63_vm2, %v56_v63, 0.0 }
  0x5c   :  { %v532_v24 = vsel %vm514_vm6, %v488_v50, %v531_v19  ;;  %v538_v25 = vsel %vm512_vm5, %v495_v61, %v537_v20  ;;  %752 = vmatmul.mubr.msk.bf16.gmra.mrb[8].mxu0 %vm559_vm1, %v22_v12  ;;  %v296_v26 = vrot.slane %v295_v49, 4  ;;  %v302_v27 = vsel %vm63_vm2, %v57_v9, 0.0 }
  0x5d   :  { %v533_v1 = vsel %vm516_vm7, %v489_v51, %v532_v24  ;;  %v539_v2 = vsel %vm514_vm6, %v496_v62, %v538_v25  ;;  %v290_v3 = vadd.f32 %v289_v23, %v288_v14  ;;  %v303_v55 = vrot.slane %v302_v27, 4 }
  0x5e   :  { %v534_v29 = vsel %vm518_vm8, %v490_v52, %v533_v1  ;;  %v540_v30 = vsel %vm516_vm7, %v497_v5, %v539_v2  ;;  %v297_v31 = vadd.f32 %v296_v26, %v295_v49  ;;  %v309_v59 = vsel %vm63_vm2, %v58_v21, 0.0 }
  0x5f   :  { %v535_v13 = vsel %vm520_vm9, %v491_v53, %v534_v29  ;;  %v541_v16 = vsel %vm518_vm8, %v498_v6, %v540_v30  ;;  %v291_v22 = vrot.slane %v290_v3, 2  ;;  %v304_v32 = vadd.f32 %v303_v55, %v302_v27 }
  0x60   :  { %v542_v4 = vsel %vm520_vm9, %v499_v7, %v541_v16  ;;  %v298_v15 = vrot.slane %v297_v31, 2  ;;  %v310_v33 = vrot.slane %v309_v59, 4  ;;  %v316_v34 = vsel %vm63_vm2, %v59_v28, 0.0 }
  0x61   :  { %v551_v35 = vpack.c.b16 %v542_v4, %v535_v13  ;;  %v292_v37 = vadd.f32 %v291_v22, %v290_v3  ;;  %v305_v38 = vrot.slane %v304_v32, 2  ;;  %v317_v39 = vrot.slane %v316_v34, 4 }
  0x62   :  { %v299_v40 = vadd.f32 %v298_v15, %v297_v31  ;;  %v311_v41 = vadd.f32 %v310_v33, %v309_v59  ;;  %v323_v42 = vsel %vm63_vm2, %v60_v17, 0.0  ;;  %v330_v43 = vsel %vm63_vm2, %v61_v18, 0.0 }
  0x63   :  { %734 = vmatmul.mubr.msk.bf16.gmra.mrb[4].mxu1 %vm559_vm1, %v551_v35  ;;  %v293_v44 = vrot.slane %v292_v37, 1  ;;  %v306_v45 = vadd.f32 %v305_v38, %v304_v32  ;;  %v318_v46 = vadd.f32 %v317_v39, %v316_v34  ;;  %v324_v47 = vrot.slane %v323_v42, 4 }
  0x64   :  { %737 = vmatprep.mubr.msk.bf16.mxu1 %vm765_vm0, %v764_v0  ;;  %v300_v48 = vrot.slane %v299_v40, 1  ;;  %v312_v50 = vrot.slane %v311_v41, 2  ;;  %v331_v51 = vrot.slane %v330_v43, 4  ;;  %v337_v52 = vsel %vm63_vm2, %v62_v36, 0.0 }
  0x65   :  { %v294_v53 = vadd.f32 %v293_v44, %v292_v37  ;;  %v307_v54 = vrot.slane %v306_v45, 1  ;;  %v319_v56 = vrot.slane %v318_v46, 2  ;;  %v325_v57 = vadd.f32 %v324_v47, %v323_v42 }
  0x66   :  { %v301_v58 = vadd.f32 %v300_v48, %v299_v40  ;;  %v313_v60 = vadd.f32 %v312_v50, %v311_v41  ;;  %v332_v61 = vadd.f32 %v331_v51, %v330_v43  ;;  %v338_v62 = vrot.slane %v337_v52, 4 }
  0x67   :  { %v308_v63 = vadd.f32 %v307_v54, %v306_v45  ;;  %v320_v5 = vadd.f32 %v319_v56, %v318_v46  ;;  %v326_v6 = vrot.slane %v325_v57, 2  ;;  %v376_v7 = vmul.f32 0.25, %v294_v53 }
  0x68   :  { %v314_v8 = vrot.slane %v313_v60, 1  ;;  %v333_v9 = vrot.slane %v332_v61, 2  ;;  %v339_v0 = vadd.f32 %v338_v62, %v337_v52  ;;  %v377_v10 = vmul.f32 0.25, %v301_v58 }
  0x69   :  { %v321_v11 = vrot.slane %v320_v5, 1  ;;  %v327_v12 = vadd.f32 %v326_v6, %v325_v57  ;;  %v378_v14 = vmul.f32 0.25, %v308_v63  ;;  %v416_v19 = vpack.c.bf16 %v376_v7, %v376_v7 }
  0x6a   :  { %v315_v20 = vadd.f32 %v314_v8, %v313_v60  ;;  %v334_v21 = vadd.f32 %v333_v9, %v332_v61  ;;  %v340_v23 = vrot.slane %v339_v0, 2  ;;  %v417_v49 = vpack.c.bf16 %v377_v10, %v377_v10 }
  0x6b   :  { %v322_v24 = vadd.f32 %v321_v11, %v320_v5  ;;  %v328_v25 = vrot.slane %v327_v12, 1  ;;  %v418_v26 = vpack.c.bf16 %v378_v14, %v378_v14  ;;  %v500_v27 = vunpack.c.l.b16 %v416_v19 }
  0x6c   :  { %v335_v1 = vrot.slane %v334_v21, 1  ;;  %v341_v2 = vadd.f32 %v340_v23, %v339_v0  ;;  %v379_v28 = vmul.f32 0.25, %v315_v20  ;;  %v501_v3 = vunpack.c.l.b16 %v417_v49 }
  0x6d   :  { %v329_v55 = vadd.f32 %v328_v25, %v327_v12  ;;  %v380_v29 = vmul.f32 0.25, %v322_v24  ;;  %v502_v30 = vunpack.c.l.b16 %v418_v26  ;;  %vm701_vm10 = vcmask 261120  }
  0x6e   :  { %v336_v31 = vadd.f32 %v335_v1, %v334_v21  ;;  %v342_v59 = vrot.slane %v341_v2, 1  ;;  %v419_v13 = vpack.c.bf16 %v379_v28, %v379_v28  ;;  %v543_v16 = vsel %vm508_vm3, %v501_v3, %v500_v27 }
  0x6f   :  { %v381_v17 = vmul.f32 0.25, %v329_v55  ;;  %v420_v18 = vpack.c.bf16 %v380_v29, %v380_v29  ;;  %v544_v22 = vsel %vm510_vm4, %v502_v30, %v543_v16 }
  0x70   :  { %v343_v32 = vadd.f32 %v342_v59, %v341_v2  ;;  %v382_v4 = vmul.f32 0.25, %v336_v31  ;;  %v503_v15 = vunpack.c.l.b16 %v419_v13 }
  0x71   :  { %v421_v33 = vpack.c.bf16 %v381_v17, %v381_v17  ;;  %v504_v34 = vunpack.c.l.b16 %v420_v18 }
  0x72   :  { %v383_v35 = vmul.f32 0.25, %v343_v32  ;;  %v422_v36 = vpack.c.bf16 %v382_v4, %v382_v4  ;;  %v545_v37 = vsel %vm512_vm5, %v503_v15, %v544_v22 }
  0x73   :  { %v505_v38 = vunpack.c.l.b16 %v421_v33  ;;  %v546_v39 = vsel %vm514_vm6, %v504_v34, %v545_v37 }
  0x74   :  { %v423_v40 = vpack.c.bf16 %v383_v35, %v383_v35  ;;  %v506_v41 = vunpack.c.l.b16 %v422_v36 }
  0x75   :  { %v547_v42 = vsel %vm516_vm7, %v505_v38, %v546_v39 }
  0x76   :  { %v507_v43 = vunpack.c.l.b16 %v423_v40  ;;  %v548_v44 = vsel %vm518_vm8, %v506_v41, %v547_v42 }
  0x78   :  { %v549_v45 = vsel %vm520_vm9, %v507_v43, %v548_v44 }
  0x79   :  { %v552_v46 = vpack.c.b16 %v549_v45, %v549_v45 }
  0x7b   :  { %738 = vmatmul.mubr.msk.bf16.gmra.mrb[8].mxu1 %vm559_vm1, %v552_v46 }
  0xd9   :  { %v674_v47 = vpop.f32.mrb[0].mxu0 }
  0xda   :  { %v745_v48 = vpop.f32.mrb[1].mxu0 }
  0xdb   :  { %v677_v50 = vpop.f32.mrb[2].mxu0 }
  0xdc   :  { %v746_v51 = vpop.f32.mrb[3].mxu0 }
 0x103   :  { %v682_v52 = vpop.f32.mrb[4].mxu0 }
 0x104   :  { %v749_v53 = vpop.f32.mrb[5].mxu0 }
 0x105   :  { %v685_v54 = vpop.f32.mrb[6].mxu0 }
 0x106   :  { %v750_v56 = vpop.f32.mrb[7].mxu0 }
 0x10a   :  { %v603_v57 = vpop.f32.mrb[0].mxu1 }
 0x10b   :  { %v675_v58 = vadd.f32 %v674_v47, %v603_v57  ;;  %v731_v60 = vpop.f32.mrb[1].mxu1 }
 0x10c   :  { %v606_v61 = vpop.f32.mrb[2].mxu1 }
 0x10d   :  { %v696_v62 = vmax.f32 %v675_v58, 0.0  ;;  %v678_v63 = vadd.f32 %v677_v50, %v606_v61  ;;  %v732_v5 = vpop.f32.mrb[3].mxu1 }
 0x10f   :  { %702 = vst.msk [vmem:[%s1066_s3] sm:$0xff] %vm701_vm10, %v696_v62  ;;  %v697_v6 = vmax.f32 %v678_v63, 0.0 }
 0x111   :  { %703 = vst.msk [vmem:[%s1066_s3 + $0x8] sm:$0xff] %vm701_vm10, %v697_v6 }
 0x12f   :  { %v690_v7 = vpop.f32.mrb[8].mxu0 }
 0x130   :  { %v753_v8 = vpop.f32.mrb[9].mxu0 }
 0x131   :  { %v693_v9 = vpop.f32.mrb[10].mxu0 }
 0x132   :  { %v754_v0 = vpop.f32.mrb[11].mxu0 }
 0x136   :  { %v611_v10 = vpop.f32.mrb[4].mxu1 }
 0x137   :  { %v683_v11 = vadd.f32 %v682_v52, %v611_v10  ;;  %v735_v12 = vpop.f32.mrb[5].mxu1 }
 0x138   :  { %v614_v14 = vpop.f32.mrb[6].mxu1 }
 0x139   :  { %v698_v19 = vmax.f32 %v683_v11, 0.0  ;;  %v686_v20 = vadd.f32 %v685_v54, %v614_v14  ;;  %v736_v21 = vpop.f32.mrb[7].mxu1 }
 0x13b   :  { %704 = vst.msk [vmem:[%s1066_s3 + $0x10] sm:$0xff] %vm701_vm10, %v698_v19  ;;  %v699_v23 = vmax.f32 %v686_v20, 0.0 }
 0x13d   :  { %705 = vst.msk [vmem:[%s1066_s3 + $0x18] sm:$0xff] %vm701_vm10, %v699_v23 }
 0x14e   :  { %v619_v49 = vpop.f32.mrb[8].mxu1 }
 0x14f   :  { %v691_v24 = vadd.f32 %v690_v7, %v619_v49  ;;  %v739_v25 = vpop.f32.mrb[9].mxu1 }
 0x150   :  { %v622_v26 = vpop.f32.mrb[10].mxu1 }
 0x151   :  { %v700_v27 = vmax.f32 %v691_v24, 0.0  ;;  %v740_v1 = vpop.f32.mrb[11].mxu1 }
 0x153   :  { %706 = vst.msk [vmem:[%s1066_s3 + $0x20] sm:$0xff] %vm701_vm10, %v700_v27 }

</bundles_post_ra>
